<compile_context>
chip_gen: v7x
topology: tpu7x:2x2x1
jax: 0.10.0
libtpu: 0.0.40
codegen_flags: <defaults>
</compile_context>

<pallas_src>
import jax
import jax.numpy as jnp
from jax.experimental import pallas as pl
from jax.experimental.pallas import tpu as pltpu

LANE = 128
MAX_TILE = 1024  # rows per grid step before we split further


def _round_up(n, m):
    return ((n + m - 1) // m) * m


def _mlp_kernel(x_ref, w1_ref, b1_ref, w2_ref, b2_ref, w3_ref, b3_ref, o_ref):
    # Cast to bf16 on the VPU (VALU slot has huge slack); all matmuls accumulate in f32.
    x = x_ref[...].astype(jnp.bfloat16)
    # Layer 1: Linear(state_dim -> h1p) + ReLU.
    h1 = jnp.dot(x, w1_ref[...], preferred_element_type=jnp.float32)
    h1 = jnp.maximum(h1 + b1_ref[...], 0.0)
    # Dropout(0.1): identity at inference time.
    # Layer 2: Linear(h1p -> h2p) + ReLU.
    h2 = jnp.dot(h1.astype(jnp.bfloat16), w2_ref[...], preferred_element_type=jnp.float32)
    h2 = jnp.maximum(h2 + b2_ref[...], 0.0)
    # Layer 3: Linear(h2p -> action_dim). Output block is exactly the real columns.
    out = jnp.dot(h2.astype(jnp.bfloat16), w3_ref[...], preferred_element_type=jnp.float32)
    o_ref[...] = (out + b3_ref[...]).astype(o_ref.dtype)


def prepare_params(params):
    """One-time padding/casting of the weights (hoisted out of the per-call path).

    Hidden dims are zero-padded to the 128-lane vreg width (exact through ReLU); the final
    layer keeps its real output width so the kernel's store is exactly action_dim wide.
    Weights are bf16 (MXU inputs); biases stay f32 (added after f32 accumulation).
    """
    w1, b1 = params["W1"], params["b1"]
    w2, b2 = params["W2"], params["b2"]
    w3, b3 = params["W3"], params["b3"]
    state_dim, h1 = w1.shape
    h2, action_dim = w2.shape[1], w3.shape[1]
    h1p = _round_up(h1, LANE)
    h2p = _round_up(h2, LANE)

    def pad_w(w, rows, cols):
        return jnp.pad(w, ((0, rows - w.shape[0]), (0, cols - w.shape[1])))

    return {
        "W1": pad_w(w1, state_dim, h1p).astype(jnp.bfloat16),
        "b1": jnp.pad(b1, (0, h1p - h1)).reshape(1, h1p).astype(jnp.float32),
        "W2": pad_w(w2, h1p, h2p).astype(jnp.bfloat16),
        "b2": jnp.pad(b2, (0, h2p - h2)).reshape(1, h2p).astype(jnp.float32),
        "W3": pad_w(w3, h2p, action_dim).astype(jnp.bfloat16),  # output dim NOT padded
        "b3": b3.reshape(1, action_dim).astype(jnp.float32),
    }


def _choose_batch_tile(B):
    # Balanced tiles: never pad more than ~16 rows per tile, and make sure there are at
    # least 2 grid steps when the batch is large enough so v7x's 2 TCs both get work.
    num_tiles = pl.cdiv(B, MAX_TILE)
    if B >= 512:
        num_tiles = max(2, num_tiles)
    return _round_up(pl.cdiv(B, num_tiles), 16)


def legacy_qnetwork_forward(x, prepared, *, batch_tile=None):
    """x: [B, state_dim] float32. prepared: output of prepare_params()."""
    B, state_dim = x.shape
    w1p, b1p = prepared["W1"], prepared["b1"]
    w2p, b2p = prepared["W2"], prepared["b2"]
    w3p, b3p = prepared["W3"], prepared["b3"]
    h1p, h2p = w1p.shape[1], w2p.shape[1]
    action_dim = w3p.shape[1]

    if batch_tile is None:
        batch_tile = _choose_batch_tile(B)
    Bp = _round_up(B, batch_tile)
    xp = x if Bp == B else jnp.pad(x, ((0, Bp - B), (0, 0)))  # stays f32; cast in-kernel

    const = lambda shape: pl.BlockSpec(shape, lambda i: (0, 0))  # grid-invariant (loaded once)

    out = pl.pallas_call(
        _mlp_kernel,
        out_shape=jax.ShapeDtypeStruct((Bp, action_dim), jnp.float32),
        grid_spec=pl.GridSpec(
            grid=(Bp // batch_tile,),
            in_specs=[
                pl.BlockSpec((batch_tile, state_dim), lambda i: (i, 0)),  # x tile (f32)
                const((state_dim, h1p)),    # W1 (bf16)
                const((1, h1p)),            # b1
                const((h1p, h2p)),          # W2
                const((1, h2p)),            # b2
                const((h2p, action_dim)),   # W3 (real output width)
                const((1, action_dim)),     # b3
            ],
            out_specs=pl.BlockSpec((batch_tile, action_dim), lambda i: (i, 0)),
        ),
        compiler_params=pltpu.CompilerParams(dimension_semantics=("parallel",)),
    )(xp, w1p, b1p, w2p, b2p, w3p, b3p)

    return out if Bp == B else out[:B]


def init_params(key, state_dim, action_dim, hidden_dims=(64, 32)):
    """Xavier-uniform weights, zero biases — matches _init_weights in the module."""
    dims = [state_dim, *hidden_dims, action_dim]
    params = {}
    for idx, (fan_in, fan_out) in enumerate(zip(dims[:-1], dims[1:]), start=1):
        key, sub = jax.random.split(key)
        limit = jnp.sqrt(6.0 / (fan_in + fan_out))
        # Stored as [in, out] (transpose of PyTorch's [out, in]) so the kernel does x @ W.
        params[f"W{idx}"] = jax.random.uniform(
            sub, (fan_in, fan_out), jnp.float32, minval=-limit, maxval=limit
        )
        params[f"b{idx}"] = jnp.zeros((fan_out,), jnp.float32)
    return params


def _reference_forward(x, params):
    """Pure-JAX reference mirroring the kernel's bf16-input / f32-accumulate numerics."""
    f32 = jnp.float32
    bf = lambda a: a.astype(jnp.bfloat16).astype(f32)
    w1, w2, w3 = bf(params["W1"]), bf(params["W2"]), bf(params["W3"])
    b1, b2, b3 = params["b1"], params["b2"], params["b3"]
    h = jnp.maximum(bf(x) @ w1 + b1, 0.0)
    h = jnp.maximum(bf(h) @ w2 + b2, 0.0)
    return bf(h) @ w3 + b3


if __name__ == "__main__":
    key = jax.random.PRNGKey(0)
    batch, state_dim, action_dim = 8, 16, 4

    k_params, k_x = jax.random.split(key)
    params = init_params(k_params, state_dim, action_dim, hidden_dims=(64, 32))
    x = jax.random.normal(k_x, (batch, state_dim), jnp.float32)

    prepared = prepare_params(params)  # one-time pad/cast, hoisted out of the forward
    out = legacy_qnetwork_forward(x, prepared)
    out = jax.block_until_ready(out)

    ref = _reference_forward(x, params)
    assert out.shape == (batch, action_dim), out.shape
    assert jnp.allclose(out, ref, atol=1e-2, rtol=1e-2), jnp.max(jnp.abs(out - ref))

    print("KERNEL_OK")
</pallas_src>

<mosaic_0001>
module attributes {stable_mosaic.version = 11 : i64} {
  func.func @_mlp_kernel(%arg0: i32, %arg1: memref<16x16xf32, #tpu.memory_space<vmem>>, %arg2: memref<16x128xbf16, #tpu.memory_space<vmem>>, %arg3: memref<1x128xf32, #tpu.memory_space<vmem>>, %arg4: memref<128x128xbf16, #tpu.memory_space<vmem>>, %arg5: memref<1x128xf32, #tpu.memory_space<vmem>>, %arg6: memref<128x4xbf16, #tpu.memory_space<vmem>>, %arg7: memref<1x4xf32, #tpu.memory_space<vmem>>, %arg8: memref<16x4xf32, #tpu.memory_space<vmem>>) attributes {dimension_semantics = [#tpu.dimension_semantics<parallel>], iteration_bounds = array<i64: 1>, scalar_prefetch = 0 : i64, scratch_operands = 0 : i64, tpu.core_type = #tpu.core_type<tc>, window_params = [{transform_indices = @transform_0, window_bounds = array<i64: 16, 16>}, {pipeline_mode = #tpu.pipeline_mode<synchronous>, transform_indices = @transform_1, window_bounds = array<i64: 16, 128>}, {pipeline_mode = #tpu.pipeline_mode<synchronous>, transform_indices = @transform_2, window_bounds = array<i64: 1, 128>}, {pipeline_mode = #tpu.pipeline_mode<synchronous>, transform_indices = @transform_3, window_bounds = array<i64: 128, 128>}, {pipeline_mode = #tpu.pipeline_mode<synchronous>, transform_indices = @transform_4, window_bounds = array<i64: 1, 128>}, {pipeline_mode = #tpu.pipeline_mode<synchronous>, transform_indices = @transform_5, window_bounds = array<i64: 128, 4>}, {pipeline_mode = #tpu.pipeline_mode<synchronous>, transform_indices = @transform_6, window_bounds = array<i64: 1, 4>}, {transform_indices = @transform_7, window_bounds = array<i64: 16, 4>}]} {
    %c0 = arith.constant 0 : index
    %c0_0 = arith.constant 0 : index
    %0 = vector.load %arg1[%c0, %c0_0] : memref<16x16xf32, #tpu.memory_space<vmem>>, vector<16x16xf32>
    %1 = arith.truncf %0 : vector<16x16xf32> to vector<16x16xbf16>
    %c0_1 = arith.constant 0 : index
    %c0_2 = arith.constant 0 : index
    %2 = vector.load %arg2[%c0_1, %c0_2] : memref<16x128xbf16, #tpu.memory_space<vmem>>, vector<16x128xbf16>
    %cst = arith.constant dense<0.000000e+00> : vector<16x128xf32>
    %3 = tpu.matmul %1, %2, %cst {dimension_numbers = #tpu.dot_dimension_numbers<[1], [0], [0], [1], [0, 0, 1, 1], [], []>} : vector<16x16xbf16>, vector<16x128xbf16>, vector<16x128xf32> -> vector<16x128xf32>
    %c0_3 = arith.constant 0 : index
    %c0_4 = arith.constant 0 : index
    %4 = vector.load %arg3[%c0_3, %c0_4] : memref<1x128xf32, #tpu.memory_space<vmem>>, vector<1x128xf32>
    %5 = vector.broadcast %4 : vector<1x128xf32> to vector<16x128xf32>
    %6 = arith.addf %3, %5 : vector<16x128xf32>
    %cst_5 = arith.constant 0.000000e+00 : f32
    %7 = vector.broadcast %cst_5 : f32 to vector<16x128xf32>
    %8 = arith.maximumf %6, %7 : vector<16x128xf32>
    %9 = arith.truncf %8 : vector<16x128xf32> to vector<16x128xbf16>
    %c0_6 = arith.constant 0 : index
    %c0_7 = arith.constant 0 : index
    %10 = vector.load %arg4[%c0_6, %c0_7] : memref<128x128xbf16, #tpu.memory_space<vmem>>, vector<128x128xbf16>
    %cst_8 = arith.constant dense<0.000000e+00> : vector<16x128xf32>
    %11 = tpu.matmul %9, %10, %cst_8 {dimension_numbers = #tpu.dot_dimension_numbers<[1], [0], [0], [1], [0, 0, 1, 1], [], []>} : vector<16x128xbf16>, vector<128x128xbf16>, vector<16x128xf32> -> vector<16x128xf32>
    %c0_9 = arith.constant 0 : index
    %c0_10 = arith.constant 0 : index
    %12 = vector.load %arg5[%c0_9, %c0_10] : memref<1x128xf32, #tpu.memory_space<vmem>>, vector<1x128xf32>
    %13 = vector.broadcast %12 : vector<1x128xf32> to vector<16x128xf32>
    %14 = arith.addf %11, %13 : vector<16x128xf32>
    %cst_11 = arith.constant 0.000000e+00 : f32
    %15 = vector.broadcast %cst_11 : f32 to vector<16x128xf32>
    %16 = arith.maximumf %14, %15 : vector<16x128xf32>
    %17 = arith.truncf %16 : vector<16x128xf32> to vector<16x128xbf16>
    %c0_12 = arith.constant 0 : index
    %c0_13 = arith.constant 0 : index
    %18 = vector.load %arg6[%c0_12, %c0_13] : memref<128x4xbf16, #tpu.memory_space<vmem>>, vector<128x4xbf16>
    %cst_14 = arith.constant dense<0.000000e+00> : vector<16x4xf32>
    %19 = tpu.matmul %17, %18, %cst_14 {dimension_numbers = #tpu.dot_dimension_numbers<[1], [0], [0], [1], [0, 0, 1, 1], [], []>} : vector<16x128xbf16>, vector<128x4xbf16>, vector<16x4xf32> -> vector<16x4xf32>
    %c0_15 = arith.constant 0 : index
    %c0_16 = arith.constant 0 : index
    %20 = vector.load %arg7[%c0_15, %c0_16] : memref<1x4xf32, #tpu.memory_space<vmem>>, vector<1x4xf32>
    %21 = vector.broadcast %20 : vector<1x4xf32> to vector<16x4xf32>
    %22 = arith.addf %19, %21 : vector<16x4xf32>
    %c0_17 = arith.constant 0 : index
    %c0_18 = arith.constant 0 : index
    %23 = vector.load %arg8[%c0_17, %c0_18] : memref<16x4xf32, #tpu.memory_space<vmem>>, vector<16x4xf32>
    tpu.vector_store %arg8[%c0_17, %c0_18], %22 {strides = array<i32>} : memref<16x4xf32, #tpu.memory_space<vmem>>, vector<16x4xf32>,
    return
  }
  func.func @transform_0(%arg0: i32) -> (i32, i32) {
    %c0_i32 = arith.constant 0 : i32
    %c0_i32_0 = arith.constant 0 : i32
    return %arg0, %c0_i32 : i32, i32
  }
  func.func @transform_1(%arg0: i32) -> (i32, i32) {
    %c0_i32 = arith.constant 0 : i32
    %c0_i32_0 = arith.constant 0 : i32
    %c0_i32_1 = arith.constant 0 : i32
    return %c0_i32, %c0_i32_0 : i32, i32
  }
  func.func @transform_2(%arg0: i32) -> (i32, i32) {
    %c0_i32 = arith.constant 0 : i32
    %c0_i32_0 = arith.constant 0 : i32
    %c0_i32_1 = arith.constant 0 : i32
    return %c0_i32, %c0_i32_0 : i32, i32
  }
  func.func @transform_3(%arg0: i32) -> (i32, i32) {
    %c0_i32 = arith.constant 0 : i32
    %c0_i32_0 = arith.constant 0 : i32
    %c0_i32_1 = arith.constant 0 : i32
    return %c0_i32, %c0_i32_0 : i32, i32
  }
  func.func @transform_4(%arg0: i32) -> (i32, i32) {
    %c0_i32 = arith.constant 0 : i32
    %c0_i32_0 = arith.constant 0 : i32
    %c0_i32_1 = arith.constant 0 : i32
    return %c0_i32, %c0_i32_0 : i32, i32
  }
  func.func @transform_5(%arg0: i32) -> (i32, i32) {
    %c0_i32 = arith.constant 0 : i32
    %c0_i32_0 = arith.constant 0 : i32
    %c0_i32_1 = arith.constant 0 : i32
    return %c0_i32, %c0_i32_0 : i32, i32
  }
  func.func @transform_6(%arg0: i32) -> (i32, i32) {
    %c0_i32 = arith.constant 0 : i32
    %c0_i32_0 = arith.constant 0 : i32
    %c0_i32_1 = arith.constant 0 : i32
    return %c0_i32, %c0_i32_0 : i32, i32
  }
  func.func @transform_7(%arg0: i32) -> (i32, i32) {
    %c0_i32 = arith.constant 0 : i32
    %c0_i32_0 = arith.constant 0 : i32
    return %arg0, %c0_i32 : i32, i32
  }
}

</mosaic_0001>

<bundles_post_ra>
// kernel: tpu_custom_call.1
= control target key start
LH: loop header
LB: loop body
LE: loop exit
PB: predicated region body
PF: predicated region fallthrough
CT: control target
= control target key end

     0   :  { %12 = vsyncpa [#allocation3], 0  ;;  %s475_s24 = smov [#allocation2]   ;;  %s621_s0 = inlined_call_operand.hbm [shape: f32[16,16], index: 0, kind: input, shape index: {}]   ;;  %s622_s1 = inlined_call_operand.vmem [shape: bf16[16,128], index: 1, kind: input, shape index: {}]   ;;  %s623_s2 = inlined_call_operand.vmem [shape: f32[1,128], index: 2, kind: input, shape index: {}]   ;;  %s624_s3 = inlined_call_operand.vmem [shape: bf16[128,128], index: 3, kind: input, shape index: {}]   ;;  %s625_s4 = inlined_call_operand.vmem [shape: f32[1,128], index: 4, kind: input, shape index: {}]   ;;  %s626_s5 = inlined_call_operand.vmem [shape: bf16[128,4], index: 5, kind: input, shape index: {}]   ;;  %s627_s6 = inlined_call_operand.vmem [shape: f32[1,4], index: 6, kind: input, shape index: {}]   ;;  %s628_s7 = inlined_call_operand.vmem [shape: f32[16,4], index: 7, kind: output, shape index: {}]  }
   0x1   :  { %s18_s25 = sshll.u32 %s475_s24, 4  ;;  %s451_s28 = scalar_lea.hbm %s621_s0, 256  ;;  %s19_s25 = int_to_ptr.vmem [resolvable:$true] %s18_s25 }
   0x2   :  { %p452_p0 = scmp.ne.s32.totalorder %s621_s0, %s451_s28  ;;  %p455_p1 = scmp.lt.u32.totalorder %s451_s28, %s621_s0 }
   0x4   :  { %p457_p2 = pnand %p455_p1, %p452_p0 }
   0x6   :  { %460 = shalt.err (!%p457_p2)
}
   0x7   :  { %s461_s10 = scalar_lea.vmem %s19_s25, 256  ;;  %p466_p4 = scmp.lt.s32.totalorder %s19_s25, %s19_s25 }
   0x8   :  { %p462_p3 = scmp.ne.s32.totalorder %s19_s25, %s461_s10  ;;  %p467_p5 = scmp.lt.s32.totalorder %s461_s10, %s461_s10 }
   0xa   :  { %p468_p6 = por %p467_p5, %p466_p4 }
   0xc   :  { %p469_p7 = pnand %p468_p6, %p462_p3 }
   0xe   :  { %472 = shalt.err (!%p469_p7)
}
   0xf   :  { %s476_s11 = smov 128   ;;  %s477_s12 = smov 8  }
  0x10   :  { %24 = dma.hbm_to_vmem [thread:$0]  %s621_s0, 256, %s19_s25, [#allocation3], %s476_s11, %s476_s11, %s477_s12  }
  0x11   :  { %473 = dma.done.wait [#allocation3], 256  }
  0x12   :  { %474 = vsyncadd [#allocation3], 4294967040  ;;  %v478_v0 = vmov 0.0   ;;  %vm479_vm0 = vmmov 0   ;;  %v434_v1 = vld [vmem:[%s622_s1] sm:$0xff]   ;;  %v42_v3 = vld [vmem:[#allocation2 + $0x8] sm:$0xff] }
  0x13   :  { %383 = vmatprep.subr.bf16.mxu0 %v478_v0  ;;  %385 = vmatprep.mubr.msk.bf16.mxu0 %vm479_vm0, %v478_v0  ;;  %v41_v2 = vld [vmem:[#allocation2] sm:$0xff]  ;;  %vm59_vm1 = vcmask 130048   ;;  %v436_v6 = vld [vmem:[%s624_s3 + $0x8] sm:$0xff]   ;;  %v437_v7 = vld [vmem:[%s624_s3 + $0x10] sm:$0xff]   ;;  %vm334_vm2 = vcmask 31744  }
  0x14   :  { %389 = vmatprep.subr.bf16.mxu1 %v478_v0  ;;  %405 = vmatprep.mubr.msk.bf16.mxu1 %vm479_vm0, %v478_v0  ;;  %v43_v4 = vpack.c.bf16 %v42_v3, %v41_v2  ;;  %v435_v5 = vld [vmem:[%s624_s3] sm:$0xff]   ;;  %v438_v8 = vld [vmem:[%s624_s3 + $0x18] sm:$0xff]   ;;  %v440_v10 = vld [vmem:[%s624_s3 + $0x28] sm:$0xff]  }
  0x15   :  { %384 = vmatpush3.bf16.msra.mxu0 %v434_v1  ;;  %390 = vmatpush3.bf16.msra.mxu1 %v435_v5  ;;  %v439_v9 = vld [vmem:[%s624_s3 + $0x20] sm:$0xff]   ;;  %v441_v11 = vld [vmem:[%s624_s3 + $0x30] sm:$0xff]   ;;  %v442_v12 = vld [vmem:[%s624_s3 + $0x38] sm:$0xff]  }
  0x16   :  { %409 = vmatprep.subr.bf16.mxu0 %v478_v0  ;;  %391 = vmatprep.subr.bf16.mxu1 %v478_v0  ;;  %v443_v13 = vld [vmem:[%s626_s5] sm:$0xff]   ;;  %v444_v14 = vld [vmem:[%s626_s5 + $0x8] sm:$0xff]   ;;  %v445_v15 = vld [vmem:[%s626_s5 + $0x10] sm:$0xff]  }
  0x17   :  { %v446_v16 = vld [vmem:[%s626_s5 + $0x18] sm:$0xff]   ;;  %v447_v17 = vld [vmem:[%s626_s5 + $0x20] sm:$0xff]   ;;  %v448_v18 = vld [vmem:[%s626_s5 + $0x28] sm:$0xff]  }
  0x18   :  { %386 = vmatmul.mubr.msk.bf16.vlgmr.msra.gmra.mrb[0].mxu0 %vm59_vm1, %v43_v4  ;;  %v342_v19 = vld [vmem:[%s623_s2] ss:$0 sm:$0xff]  ;;  %v449_v29 = vld [vmem:[%s626_s5 + $0x30] sm:$0xff]   ;;  %v450_v30 = vld [vmem:[%s626_s5 + $0x38] sm:$0xff]  }
  0x19   :  { %425 = vmatprep.mubr.msk.bf16.mxu0 %vm479_vm0, %v478_v0  ;;  %392 = vmatpush3.bf16.msra.mxu1 %v436_v6  ;;  %v345_v31 = vld [vmem:[%s625_s4] ss:$0 sm:$0xff] }
  0x1a   :  { %393 = vmatprep.subr.bf16.mxu1 %v478_v0  ;;  %410 = vmatpush3.bf16.msra.mxu0 %v443_v13  ;;  %v354_v41 = vld [vmem:[%s627_s6] ss:$0 sm:$0xff] }
  0x1b   :  { %411 = vmatprep.subr.bf16.mxu0 %v478_v0 }
  0x1d   :  { %394 = vmatpush3.bf16.msra.mxu1 %v437_v7 }
  0x1e   :  { %395 = vmatprep.subr.bf16.mxu1 %v478_v0  ;;  %412 = vmatpush3.bf16.msra.mxu0 %v444_v14 }
  0x1f   :  { %413 = vmatprep.subr.bf16.mxu0 %v478_v0 }
  0x21   :  { %396 = vmatpush3.bf16.msra.mxu1 %v438_v8 }
  0x22   :  { %397 = vmatprep.subr.bf16.mxu1 %v478_v0  ;;  %414 = vmatpush3.bf16.msra.mxu0 %v445_v15 }
  0x23   :  { %415 = vmatprep.subr.bf16.mxu0 %v478_v0 }
  0x25   :  { %398 = vmatpush3.bf16.msra.mxu1 %v439_v9 }
  0x26   :  { %399 = vmatprep.subr.bf16.mxu1 %v478_v0  ;;  %416 = vmatpush3.bf16.msra.mxu0 %v446_v16 }
  0x27   :  { %417 = vmatprep.subr.bf16.mxu0 %v478_v0 }
  0x29   :  { %400 = vmatpush3.bf16.msra.mxu1 %v440_v10 }
  0x2a   :  { %401 = vmatprep.subr.bf16.mxu1 %v478_v0  ;;  %418 = vmatpush3.bf16.msra.mxu0 %v447_v17 }
  0x2b   :  { %419 = vmatprep.subr.bf16.mxu0 %v478_v0 }
  0x2d   :  { %402 = vmatpush3.bf16.msra.mxu1 %v441_v11 }
  0x2e   :  { %403 = vmatprep.subr.bf16.mxu1 %v478_v0  ;;  %420 = vmatpush3.bf16.msra.mxu0 %v448_v18 }
  0x2f   :  { %421 = vmatprep.subr.bf16.mxu0 %v478_v0 }
  0x31   :  { %404 = vmatpush3.bf16.msra.mxu1 %v442_v12 }
  0x32   :  { %422 = vmatpush3.bf16.msra.mxu0 %v449_v29 }
  0x33   :  { %423 = vmatprep.subr.bf16.mxu0 %v478_v0 }
  0x36   :  { %424 = vmatpush3.bf16.msra.mxu0 %v450_v30 }
  0xeb   :  { %v97_v20 = vpop.f32.mrb[0].mxu0 }
  0xec   :  { %v98_v21 = vadd.f32 %v342_v19, %v97_v20  ;;  %v387_v22 = vpop.f32.mrb[1].mxu0 }
  0xed   :  { %v100_v23 = vpop.f32.mrb[2].mxu0 }
  0xee   :  { %v101_v24 = vadd.f32 %v342_v19, %v100_v23  ;;  %v388_v25 = vpop.f32.mrb[3].mxu0  ;;  %v104_v26 = vmax.f32 %v98_v21, 0.0 }
  0xf0   :  { %v105_v27 = vmax.f32 %v101_v24, 0.0 }
  0xf2   :  { %v106_v28 = vpack.c.bf16 %v105_v27, %v104_v26 }
  0xf4   :  { %406 = vmatmul.mubr.bf16.vlgmr.msra.gmra.mrb[0].mxu1 %v106_v28 }
 0x1c7   :  { %v212_v32 = vpop.f32.mrb[0].mxu1 }
 0x1c8   :  { %v213_v33 = vadd.f32 %v345_v31, %v212_v32  ;;  %v407_v34 = vpop.f32.mrb[1].mxu1 }
 0x1c9   :  { %v215_v35 = vpop.f32.mrb[2].mxu1 }
 0x1ca   :  { %v216_v36 = vadd.f32 %v345_v31, %v215_v35  ;;  %v408_v37 = vpop.f32.mrb[3].mxu1  ;;  %v219_v38 = vmax.f32 %v213_v33, 0.0 }
 0x1cc   :  { %v220_v39 = vmax.f32 %v216_v36, 0.0 }
 0x1ce   :  { %v221_v40 = vpack.c.bf16 %v220_v39, %v219_v38 }
 0x1d0   :  { %426 = vmatmul.mubr.bf16.vlgmr.msra.gmra.mrb[4].mxu0 %v221_v40 }
 0x2a3   :  { %v327_v42 = vpop.f32.mrb[4].mxu0 }
 0x2a4   :  { %v328_v43 = vadd.f32 %v354_v41, %v327_v42  ;;  %v427_v44 = vpop.f32.mrb[5].mxu0 }
 0x2a5   :  { %v330_v45 = vpop.f32.mrb[6].mxu0 }
 0x2a6   :  { %335 = vst.msk [vmem:[%s628_s7] sm:$0xff] %vm334_vm2, %v328_v43  ;;  %v331_v46 = vadd.f32 %v354_v41, %v330_v45  ;;  %v428_v47 = vpop.f32.mrb[7].mxu0 }
 0x2a8   :  { %336 = vst.msk [vmem:[%s628_s7 + $0x8] sm:$0xff] %vm334_vm2, %v331_v46 }
 0x2a9   :  { %341 = vsyncpa [#allocation3], 1 }

</bundles_post_ra>
